<compile_context>
chip_gen: v7x
topology: tpu7x:2x2x1
jax: 0.10.0
libtpu: 0.0.40
codegen_flags: <defaults>
</compile_context>

<pallas_src>
import functools

import jax
import jax.numpy as jnp
from jax.experimental import pallas as pl
from jax.experimental.pallas import tpu as pltpu

_LANE = 128          # vreg lane width  (last-dim alignment)
_SUBLANE_F32 = 8     # f32 sublane packing
_SUBLANE_BF16 = 16   # bf16 sublane packing


def _round_up(v: int, m: int) -> int:
    return ((v + m - 1) // m) * m


# --------------------------------------------------------------------------
# Kernel: whole MLP in one body.
#   refs = (x_ref, w0, b0, ..., w_{L-1}, b_{L-1}, o_ref, *scratch)
#   x_ref : (tb, D0p)        VMEM
#   w_i   : (D_ip, D_{i+1}p) VMEM (resident path)  OR  HBM/ANY (stream path)
#   b_i   : (1, D_{i+1}p)    VMEM, f32
#   o_ref : (tb, DLp)        VMEM
#   scratch (stream path only): one VMEM buffer per weight + DMA semaphores
# --------------------------------------------------------------------------
def _fused_mlp_kernel(*refs, num_layers: int, stream_weights: bool):
    x_ref = refs[0]
    o_ref = refs[1 + 2 * num_layers]
    scratch = refs[2 + 2 * num_layers:]

    copies = None
    if stream_weights:
        w_bufs = scratch[:num_layers]
        sem = scratch[num_layers]
        # Kick off ALL weight DMAs up front: layer i+1's HBM->VMEM copy
        # overlaps layer i's MXU work; each weight has exactly one buffer.
        copies = []
        for i in range(num_layers):
            cp = pltpu.make_async_copy(refs[1 + 2 * i], w_bufs[i], sem.at[i])
            cp.start()
            copies.append(cp)

    h = x_ref[...].astype(jnp.float32)
    for i in range(num_layers):
        if stream_weights:
            copies[i].wait()
            w = w_bufs[i][...]
        else:
            w = refs[1 + 2 * i][...]
        b = refs[2 + 2 * i][...]                       # f32 bias, (1, do)
        # MXU matmul (operands may be bf16), f32 accumulation; f32 epilogue.
        h = jnp.dot(h.astype(w.dtype), w, preferred_element_type=jnp.float32) + b
        if i < num_layers - 1:                         # nonlinearity = ReLU
            h = jnp.maximum(h, 0.0)
        # last layer: activation = Identity
    o_ref[...] = h.astype(o_ref.dtype)


# --------------------------------------------------------------------------
# One-time parameter prep (outside the hot path):
#   transpose PyTorch (out, in) weights -> (in, out), zero-pad feature dims to
#   lane multiples, optionally store weights in bf16.  Biases stay f32
#   (epilogue is f32).  Zero padding is exact in both dtypes.
# --------------------------------------------------------------------------
def prepare_mlp_params(params, use_bf16: bool = False):
    w_dtype = jnp.bfloat16 if use_bf16 else jnp.float32
    prepared = []
    for w, b in params:
        d_out, d_in = w.shape
        d_in_p = _round_up(d_in, _LANE)
        d_out_p = _round_up(d_out, _LANE)
        wt = jnp.zeros((d_in_p, d_out_p), jnp.float32).at[:d_in, :d_out].set(w.T)
        wt = wt.astype(w_dtype)
        bp = jnp.zeros((1, d_out_p), jnp.float32).at[:, :d_out].set(b)
        prepared.append((wt, bp))
    return prepared


# --------------------------------------------------------------------------
# Wrapper.
# --------------------------------------------------------------------------
def mlp_forward(x, prepared_params, d_out_true, *,
                batch_tile: int = 256, stream_weights=None):
    num_layers = len(prepared_params)
    batch, d_in = x.shape
    w_dtype = prepared_params[0][0].dtype
    use_bf16 = (w_dtype == jnp.bfloat16)
    d_in_p = prepared_params[0][0].shape[0]
    d_out_p = prepared_params[-1][0].shape[1]
    assert d_in <= d_in_p

    # Clamp/round the batch tile to a sublane multiple (8 f32 / 16 bf16).
    sub = _SUBLANE_BF16 if use_bf16 else _SUBLANE_F32
    b_pad = _round_up(batch, sub)
    tb = _round_up(max(sub, min(batch_tile, b_pad)), sub)
    b_pad = _round_up(b_pad, tb)          # batch > tb  =>  >= 2 grid steps
    grid_steps = b_pad // tb

    # Pad x only when actually needed (the pad is a separate HBM pass in XLA).
    if (b_pad, d_in_p) == (batch, d_in):
        x_p = x.astype(jnp.float32)
    else:
        x_p = jnp.zeros((b_pad, d_in_p), jnp.float32).at[:batch, :d_in].set(x)

    # Single grid step => no auto-pipelining to hide weight DMA => stream the
    # weights manually.  Multi-step => keep weights resident (Buffered(1)).
    if stream_weights is None:
        stream_weights = (grid_steps == 1)

    # Cost estimate for XLA's scheduler.
    flops = 0
    wb_bytes = 0
    for w, b in prepared_params:
        flops += 2 * b_pad * w.shape[0] * w.shape[1]
        wb_bytes += w.size * w.dtype.itemsize + b.size * b.dtype.itemsize
    cost = pl.CostEstimate(flops=flops, transcendentals=0,
                           bytes_accessed=wb_bytes + (x_p.size + b_pad * d_out_p) * 4)

    max_feat = max([d_in_p] + [w.shape[1] for w, _ in prepared_params])

    def _vmem_budget(weight_buffers: int) -> int:
        v = 2 * tb * (d_in_p + d_out_p) * 4                                  # pipelined x/out tiles
        v += weight_buffers * sum(w.size * w.dtype.itemsize
                                  for w, _ in prepared_params)               # weight set
        v += 2 * sum(b.size * 4 for _, b in prepared_params)                 # biases
        v += 4 * tb * max_feat * 4                                           # activation working set
        return v

    def build_and_run(single_buffer: bool):
        in_specs = [pl.BlockSpec((tb, d_in_p), lambda i: (i, 0))]
        flat_params = []
        scratch_shapes = []
        for w, b in prepared_params:
            di, do = w.shape
            if stream_weights:
                in_specs.append(pl.BlockSpec(memory_space=pl.ANY))           # raw HBM ref
                scratch_shapes.append(pltpu.VMEM((di, do), w.dtype))         # one buffer/weight
            else:
                wkw = {"pipeline_mode": pl.Buffered(1)} if single_buffer else {}
                in_specs.append(pl.BlockSpec((di, do), lambda i: (0, 0), **wkw))
            bkw = {"pipeline_mode": pl.Buffered(1)} if single_buffer else {}
            in_specs.append(pl.BlockSpec((1, do), lambda i: (0, 0), **bkw))
            flat_params.extend([w, b])
        if stream_weights:
            scratch_shapes.append(pltpu.SemaphoreType.DMA((num_layers,)))

        n_wbuf = 1 if (stream_weights or single_buffer) else 2
        vmem_limit = min(64 << 20, max(32 << 20, int(_vmem_budget(n_wbuf) * 1.5)))

        kernel = functools.partial(_fused_mlp_kernel, num_layers=num_layers,
                                   stream_weights=stream_weights)
        return pl.pallas_call(
            kernel,
            out_shape=jax.ShapeDtypeStruct((b_pad, d_out_p), jnp.float32),
            grid_spec=pltpu.PrefetchScalarGridSpec(
                num_scalar_prefetch=0,
                grid=(grid_steps,),
                in_specs=in_specs,
                out_specs=pl.BlockSpec((tb, d_out_p), lambda i: (i, 0)),
                scratch_shapes=scratch_shapes,
            ),
            compiler_params=pltpu.CompilerParams(
                dimension_semantics=("parallel",),      # batch tiles shard across TCs (v7x)
                vmem_limit_bytes=vmem_limit),
            cost_estimate=cost,
        )(x_p, *flat_params)

    try:
        out_p = build_and_run(single_buffer=True)
    except Exception:
        # This JAX build rejected pipeline_mode=pl.Buffered(1); fall back to
        # default (double) buffering — correctness is unaffected.
        out_p = build_and_run(single_buffer=False)

    if (b_pad, d_out_p) == (batch, d_out_true):
        return out_p
    return out_p[:batch, :d_out_true]


# --------------------------------------------------------------------------
# PyTorch-Linear-style init + pure-JAX reference.
# --------------------------------------------------------------------------
def init_mlp_params(key, dims):
    """U(-1/sqrt(fan_in), 1/sqrt(fan_in)) like torch.nn.Linear default."""
    params = []
    for i in range(len(dims) - 1):
        key, kw, kb = jax.random.split(key, 3)
        bound = 1.0 / jnp.sqrt(dims[i])
        w = jax.random.uniform(kw, (dims[i + 1], dims[i]),
                               minval=-bound, maxval=bound, dtype=jnp.float32)
        b = jax.random.uniform(kb, (dims[i + 1],),
                               minval=-bound, maxval=bound, dtype=jnp.float32)
        params.append((w, b))
    return params


def mlp_reference(x, params):
    n_layers = len(params)
    for i, (w, b) in enumerate(params):
        x = x @ w.T + b
        if i < n_layers - 1:
            x = jnp.maximum(x, 0.0)
    return x


if __name__ == "__main__":
    key = jax.random.PRNGKey(0)
    dims = [32, 64, 48, 16]            # MLP(dims=[32, 64, 48, 16])
    batch = 8

    key, kx, kp = jax.random.split(key, 3)
    x = jax.random.normal(kx, (batch, dims[0]), dtype=jnp.float32)
    params = init_mlp_params(kp, dims)
    ref = mlp_reference(x, params)

    # 1) f32 path, single batch tile -> streamed/overlapped weight DMA. Exact.
    prep_f32 = prepare_mlp_params(params, use_bf16=False)
    out = jax.block_until_ready(mlp_forward(x, prep_f32, dims[-1]))
    assert out.shape == (batch, dims[-1])
    assert jnp.allclose(out, ref, atol=1e-5, rtol=1e-5), "f32 mismatch vs reference"

    # 2) bf16 weights/operands (f32 accumulation + epilogue) — the v6e/v7x
    #    throughput default; looser tolerance for bf16 rounding.
    prep_bf16 = prepare_mlp_params(params, use_bf16=True)
    out_bf16 = jax.block_until_ready(mlp_forward(x, prep_bf16, dims[-1]))
    assert jnp.allclose(out_bf16, ref, atol=3e-2, rtol=3e-2), "bf16 mismatch vs reference"

    # 3) multi-tile path (grid > 1): resident Buffered(1) weights. Exact f32.
    xb = jax.random.normal(key, (64, dims[0]), dtype=jnp.float32)
    refb = mlp_reference(xb, params)
    outb = jax.block_until_ready(mlp_forward(xb, prep_f32, dims[-1], batch_tile=16))
    assert jnp.allclose(outb, refb, atol=1e-5, rtol=1e-5), "tiled mismatch vs reference"

    print("KERNEL_OK")
</pallas_src>

<mosaic_0001>
module attributes {stable_mosaic.version = 11 : i64} {
  func.func @_fused_mlp_kernel(%arg0: i32, %arg1: memref<8x128xf32, #tpu.memory_space<vmem>>, %arg2: memref<128x128xf32, #tpu.memory_space<any>>, %arg3: memref<1x128xf32, #tpu.memory_space<vmem>>, %arg4: memref<128x128xf32, #tpu.memory_space<any>>, %arg5: memref<1x128xf32, #tpu.memory_space<vmem>>, %arg6: memref<128x128xf32, #tpu.memory_space<any>>, %arg7: memref<1x128xf32, #tpu.memory_space<vmem>>, %arg8: memref<8x128xf32, #tpu.memory_space<vmem>>, %arg9: memref<128x128xf32, #tpu.memory_space<vmem>>, %arg10: memref<128x128xf32, #tpu.memory_space<vmem>>, %arg11: memref<128x128xf32, #tpu.memory_space<vmem>>, %arg12: memref<3x!tpu.dma_semaphore, #tpu.memory_space<semaphore_mem>>) attributes {dimension_semantics = [#tpu.dimension_semantics<parallel>], iteration_bounds = array<i64: 1>, scalar_prefetch = 0 : i64, scratch_operands = 4 : i64, tpu.core_type = #tpu.core_type<tc>, window_params = [{transform_indices = @transform_0, window_bounds = array<i64: 8, 128>}, {}, {pipeline_mode = #tpu.pipeline_mode<synchronous>, transform_indices = @transform_2, window_bounds = array<i64: 1, 128>}, {}, {pipeline_mode = #tpu.pipeline_mode<synchronous>, transform_indices = @transform_4, window_bounds = array<i64: 1, 128>}, {}, {pipeline_mode = #tpu.pipeline_mode<synchronous>, transform_indices = @transform_6, window_bounds = array<i64: 1, 128>}, {transform_indices = @transform_7, window_bounds = array<i64: 8, 128>}]} {
    %c0_i32 = arith.constant 0 : i32
    %0 = tpu.memref_slice %arg12[%c0_i32] : memref<3x!tpu.dma_semaphore, #tpu.memory_space<semaphore_mem>> -> memref<1x!tpu.dma_semaphore, #tpu.memory_space<semaphore_mem>>
    %1 = tpu.memref_squeeze %0 : memref<1x!tpu.dma_semaphore, #tpu.memory_space<semaphore_mem>> -> memref<!tpu.dma_semaphore, #tpu.memory_space<semaphore_mem>>
    tpu.enqueue_dma source(%arg2 : memref<128x128xf32, #tpu.memory_space<any>>) target(%arg9 : memref<128x128xf32, #tpu.memory_space<vmem>>) target_semaphore(%1 : memref<!tpu.dma_semaphore, #tpu.memory_space<semaphore_mem>>)
    %c1_i32 = arith.constant 1 : i32
    %2 = tpu.memref_slice %arg12[%c1_i32] : memref<3x!tpu.dma_semaphore, #tpu.memory_space<semaphore_mem>> -> memref<1x!tpu.dma_semaphore, #tpu.memory_space<semaphore_mem>>
    %3 = tpu.memref_squeeze %2 : memref<1x!tpu.dma_semaphore, #tpu.memory_space<semaphore_mem>> -> memref<!tpu.dma_semaphore, #tpu.memory_space<semaphore_mem>>
    tpu.enqueue_dma source(%arg4 : memref<128x128xf32, #tpu.memory_space<any>>) target(%arg10 : memref<128x128xf32, #tpu.memory_space<vmem>>) target_semaphore(%3 : memref<!tpu.dma_semaphore, #tpu.memory_space<semaphore_mem>>)
    %c2_i32 = arith.constant 2 : i32
    %4 = tpu.memref_slice %arg12[%c2_i32] : memref<3x!tpu.dma_semaphore, #tpu.memory_space<semaphore_mem>> -> memref<1x!tpu.dma_semaphore, #tpu.memory_space<semaphore_mem>>
    %5 = tpu.memref_squeeze %4 : memref<1x!tpu.dma_semaphore, #tpu.memory_space<semaphore_mem>> -> memref<!tpu.dma_semaphore, #tpu.memory_space<semaphore_mem>>
    tpu.enqueue_dma source(%arg6 : memref<128x128xf32, #tpu.memory_space<any>>) target(%arg11 : memref<128x128xf32, #tpu.memory_space<vmem>>) target_semaphore(%5 : memref<!tpu.dma_semaphore, #tpu.memory_space<semaphore_mem>>)
    %c0 = arith.constant 0 : index
    %c0_0 = arith.constant 0 : index
    %6 = vector.load %arg1[%c0, %c0_0] : memref<8x128xf32, #tpu.memory_space<vmem>>, vector<8x128xf32>
    %c0_i32_1 = arith.constant 0 : i32
    %7 = tpu.memref_slice %arg12[%c0_i32_1] : memref<3x!tpu.dma_semaphore, #tpu.memory_space<semaphore_mem>> -> memref<1x!tpu.dma_semaphore, #tpu.memory_space<semaphore_mem>>
    %8 = tpu.memref_squeeze %7 : memref<1x!tpu.dma_semaphore, #tpu.memory_space<semaphore_mem>> -> memref<!tpu.dma_semaphore, #tpu.memory_space<semaphore_mem>>
    tpu.wait_dma2 semaphore(%8 : memref<!tpu.dma_semaphore, #tpu.memory_space<semaphore_mem>>) src(%arg2 : memref<128x128xf32, #tpu.memory_space<any>>) dst(%arg9 : memref<128x128xf32, #tpu.memory_space<vmem>>)
    %c0_2 = arith.constant 0 : index
    %c0_3 = arith.constant 0 : index
    %9 = vector.load %arg9[%c0_2, %c0_3] : memref<128x128xf32, #tpu.memory_space<vmem>>, vector<128x128xf32>
    %c0_4 = arith.constant 0 : index
    %c0_5 = arith.constant 0 : index
    %10 = vector.load %arg3[%c0_4, %c0_5] : memref<1x128xf32, #tpu.memory_space<vmem>>, vector<1x128xf32>
    %cst = arith.constant dense<0.000000e+00> : vector<8x128xf32>
    %11 = tpu.matmul %6, %9, %cst {dimension_numbers = #tpu.dot_dimension_numbers<[1], [0], [0], [1], [0, 0, 1, 1], [], []>} : vector<8x128xf32>, vector<128x128xf32>, vector<8x128xf32> -> vector<8x128xf32>
    %12 = vector.broadcast %10 : vector<1x128xf32> to vector<8x128xf32>
    %13 = arith.addf %11, %12 : vector<8x128xf32>
    %cst_6 = arith.constant 0.000000e+00 : f32
    %14 = vector.broadcast %cst_6 : f32 to vector<8x128xf32>
    %15 = arith.maximumf %13, %14 : vector<8x128xf32>
    %c1_i32_7 = arith.constant 1 : i32
    %16 = tpu.memref_slice %arg12[%c1_i32_7] : memref<3x!tpu.dma_semaphore, #tpu.memory_space<semaphore_mem>> -> memref<1x!tpu.dma_semaphore, #tpu.memory_space<semaphore_mem>>
    %17 = tpu.memref_squeeze %16 : memref<1x!tpu.dma_semaphore, #tpu.memory_space<semaphore_mem>> -> memref<!tpu.dma_semaphore, #tpu.memory_space<semaphore_mem>>
    tpu.wait_dma2 semaphore(%17 : memref<!tpu.dma_semaphore, #tpu.memory_space<semaphore_mem>>) src(%arg4 : memref<128x128xf32, #tpu.memory_space<any>>) dst(%arg10 : memref<128x128xf32, #tpu.memory_space<vmem>>)
    %c0_8 = arith.constant 0 : index
    %c0_9 = arith.constant 0 : index
    %18 = vector.load %arg10[%c0_8, %c0_9] : memref<128x128xf32, #tpu.memory_space<vmem>>, vector<128x128xf32>
    %c0_10 = arith.constant 0 : index
    %c0_11 = arith.constant 0 : index
    %19 = vector.load %arg5[%c0_10, %c0_11] : memref<1x128xf32, #tpu.memory_space<vmem>>, vector<1x128xf32>
    %cst_12 = arith.constant dense<0.000000e+00> : vector<8x128xf32>
    %20 = tpu.matmul %15, %18, %cst_12 {dimension_numbers = #tpu.dot_dimension_numbers<[1], [0], [0], [1], [0, 0, 1, 1], [], []>} : vector<8x128xf32>, vector<128x128xf32>, vector<8x128xf32> -> vector<8x128xf32>
    %21 = vector.broadcast %19 : vector<1x128xf32> to vector<8x128xf32>
    %22 = arith.addf %20, %21 : vector<8x128xf32>
    %cst_13 = arith.constant 0.000000e+00 : f32
    %23 = vector.broadcast %cst_13 : f32 to vector<8x128xf32>
    %24 = arith.maximumf %22, %23 : vector<8x128xf32>
    %c2_i32_14 = arith.constant 2 : i32
    %25 = tpu.memref_slice %arg12[%c2_i32_14] : memref<3x!tpu.dma_semaphore, #tpu.memory_space<semaphore_mem>> -> memref<1x!tpu.dma_semaphore, #tpu.memory_space<semaphore_mem>>
    %26 = tpu.memref_squeeze %25 : memref<1x!tpu.dma_semaphore, #tpu.memory_space<semaphore_mem>> -> memref<!tpu.dma_semaphore, #tpu.memory_space<semaphore_mem>>
    tpu.wait_dma2 semaphore(%26 : memref<!tpu.dma_semaphore, #tpu.memory_space<semaphore_mem>>) src(%arg6 : memref<128x128xf32, #tpu.memory_space<any>>) dst(%arg11 : memref<128x128xf32, #tpu.memory_space<vmem>>)
    %c0_15 = arith.constant 0 : index
    %c0_16 = arith.constant 0 : index
    %27 = vector.load %arg11[%c0_15, %c0_16] : memref<128x128xf32, #tpu.memory_space<vmem>>, vector<128x128xf32>
    %c0_17 = arith.constant 0 : index
    %c0_18 = arith.constant 0 : index
    %28 = vector.load %arg7[%c0_17, %c0_18] : memref<1x128xf32, #tpu.memory_space<vmem>>, vector<1x128xf32>
    %cst_19 = arith.constant dense<0.000000e+00> : vector<8x128xf32>
    %29 = tpu.matmul %24, %27, %cst_19 {dimension_numbers = #tpu.dot_dimension_numbers<[1], [0], [0], [1], [0, 0, 1, 1], [], []>} : vector<8x128xf32>, vector<128x128xf32>, vector<8x128xf32> -> vector<8x128xf32>
    %30 = vector.broadcast %28 : vector<1x128xf32> to vector<8x128xf32>
    %31 = arith.addf %29, %30 : vector<8x128xf32>
    %c0_20 = arith.constant 0 : index
    %c0_21 = arith.constant 0 : index
    %32 = vector.load %arg8[%c0_20, %c0_21] : memref<8x128xf32, #tpu.memory_space<vmem>>, vector<8x128xf32>
    tpu.vector_store %arg8[%c0_20, %c0_21], %31 {strides = array<i32>} : memref<8x128xf32, #tpu.memory_space<vmem>>, vector<8x128xf32>,
    return
  }
  func.func @transform_0(%arg0: i32) -> (i32, i32) {
    %c0_i32 = arith.constant 0 : i32
    %c0_i32_0 = arith.constant 0 : i32
    return %arg0, %c0_i32 : i32, i32
  }
  func.func @transform_2(%arg0: i32) -> (i32, i32) {
    %c0_i32 = arith.constant 0 : i32
    %c0_i32_0 = arith.constant 0 : i32
    %c0_i32_1 = arith.constant 0 : i32
    return %c0_i32, %c0_i32_0 : i32, i32
  }
  func.func @transform_4(%arg0: i32) -> (i32, i32) {
    %c0_i32 = arith.constant 0 : i32
    %c0_i32_0 = arith.constant 0 : i32
    %c0_i32_1 = arith.constant 0 : i32
    return %c0_i32, %c0_i32_0 : i32, i32
  }
  func.func @transform_6(%arg0: i32) -> (i32, i32) {
    %c0_i32 = arith.constant 0 : i32
    %c0_i32_0 = arith.constant 0 : i32
    %c0_i32_1 = arith.constant 0 : i32
    return %c0_i32, %c0_i32_0 : i32, i32
  }
  func.func @transform_7(%arg0: i32) -> (i32, i32) {
    %c0_i32 = arith.constant 0 : i32
    %c0_i32_0 = arith.constant 0 : i32
    return %arg0, %c0_i32 : i32, i32
  }
}

module attributes {stable_mosaic.version = 11 : i64} {
  func.func @_fused_mlp_kernel(%arg0: i32, %arg1: memref<8x128xf32, #tpu.memory_space<vmem>>, %arg2: memref<128x128xf32, #tpu.memory_space<any>>, %arg3: memref<1x128xf32, #tpu.memory_space<vmem>>, %arg4: memref<128x128xf32, #tpu.memory_space<any>>, %arg5: memref<1x128xf32, #tpu.memory_space<vmem>>, %arg6: memref<128x128xf32, #tpu.memory_space<any>>, %arg7: memref<1x128xf32, #tpu.memory_space<vmem>>, %arg8: memref<8x128xf32, #tpu.memory_space<vmem>>, %arg9: memref<128x128xf32, #tpu.memory_space<vmem>>, %arg10: memref<128x128xf32, #tpu.memory_space<vmem>>, %arg11: memref<128x128xf32, #tpu.memory_space<vmem>>, %arg12: memref<3x!tpu.dma_semaphore, #tpu.memory_space<semaphore_mem>>) attributes {dimension_semantics = [#tpu.dimension_semantics<parallel>], iteration_bounds = array<i64: 1>, scalar_prefetch = 0 : i64, scratch_operands = 4 : i64, tpu.core_type = #tpu.core_type<tc>, window_params = [{transform_indices = @transform_0, window_bounds = array<i64: 8, 128>}, {}, {pipeline_mode = #tpu.pipeline_mode<synchronous>, transform_indices = @transform_2, window_bounds = array<i64: 1, 128>}, {}, {pipeline_mode = #tpu.pipeline_mode<synchronous>, transform_indices = @transform_4, window_bounds = array<i64: 1, 128>}, {}, {pipeline_mode = #tpu.pipeline_mode<synchronous>, transform_indices = @transform_6, window_bounds = array<i64: 1, 128>}, {transform_indices = @transform_7, window_bounds = array<i64: 8, 128>}]} {
    %c0_i32 = arith.constant 0 : i32
    %0 = tpu.memref_slice %arg12[%c0_i32] : memref<3x!tpu.dma_semaphore, #tpu.memory_space<semaphore_mem>> -> memref<1x!tpu.dma_semaphore, #tpu.memory_space<semaphore_mem>>
    %1 = tpu.memref_squeeze %0 : memref<1x!tpu.dma_semaphore, #tpu.memory_space<semaphore_mem>> -> memref<!tpu.dma_semaphore, #tpu.memory_space<semaphore_mem>>
    tpu.enqueue_dma source(%arg2 : memref<128x128xf32, #tpu.memory_space<any>>) target(%arg9 : memref<128x128xf32, #tpu.memory_space<vmem>>) target_semaphore(%1 : memref<!tpu.dma_semaphore, #tpu.memory_space<semaphore_mem>>)
    %c1_i32 = arith.constant 1 : i32
    %2 = tpu.memref_slice %arg12[%c1_i32] : memref<3x!tpu.dma_semaphore, #tpu.memory_space<semaphore_mem>> -> memref<1x!tpu.dma_semaphore, #tpu.memory_space<semaphore_mem>>
    %3 = tpu.memref_squeeze %2 : memref<1x!tpu.dma_semaphore, #tpu.memory_space<semaphore_mem>> -> memref<!tpu.dma_semaphore, #tpu.memory_space<semaphore_mem>>
    tpu.enqueue_dma source(%arg4 : memref<128x128xf32, #tpu.memory_space<any>>) target(%arg10 : memref<128x128xf32, #tpu.memory_space<vmem>>) target_semaphore(%3 : memref<!tpu.dma_semaphore, #tpu.memory_space<semaphore_mem>>)
    %c2_i32 = arith.constant 2 : i32
    %4 = tpu.memref_slice %arg12[%c2_i32] : memref<3x!tpu.dma_semaphore, #tpu.memory_space<semaphore_mem>> -> memref<1x!tpu.dma_semaphore, #tpu.memory_space<semaphore_mem>>
    %5 = tpu.memref_squeeze %4 : memref<1x!tpu.dma_semaphore, #tpu.memory_space<semaphore_mem>> -> memref<!tpu.dma_semaphore, #tpu.memory_space<semaphore_mem>>
    tpu.enqueue_dma source(%arg6 : memref<128x128xf32, #tpu.memory_space<any>>) target(%arg11 : memref<128x128xf32, #tpu.memory_space<vmem>>) target_semaphore(%5 : memref<!tpu.dma_semaphore, #tpu.memory_space<semaphore_mem>>)
    %c0 = arith.constant 0 : index
    %c0_0 = arith.constant 0 : index
    %6 = vector.load %arg1[%c0, %c0_0] : memref<8x128xf32, #tpu.memory_space<vmem>>, vector<8x128xf32>
    %c0_i32_1 = arith.constant 0 : i32
    %7 = tpu.memref_slice %arg12[%c0_i32_1] : memref<3x!tpu.dma_semaphore, #tpu.memory_space<semaphore_mem>> -> memref<1x!tpu.dma_semaphore, #tpu.memory_space<semaphore_mem>>
    %8 = tpu.memref_squeeze %7 : memref<1x!tpu.dma_semaphore, #tpu.memory_space<semaphore_mem>> -> memref<!tpu.dma_semaphore, #tpu.memory_space<semaphore_mem>>
    tpu.wait_dma2 semaphore(%8 : memref<!tpu.dma_semaphore, #tpu.memory_space<semaphore_mem>>) src(%arg2 : memref<128x128xf32, #tpu.memory_space<any>>) dst(%arg9 : memref<128x128xf32, #tpu.memory_space<vmem>>)
    %c0_2 = arith.constant 0 : index
    %c0_3 = arith.constant 0 : index
    %9 = vector.load %arg9[%c0_2, %c0_3] : memref<128x128xf32, #tpu.memory_space<vmem>>, vector<128x128xf32>
    %c0_4 = arith.constant 0 : index
    %c0_5 = arith.constant 0 : index
    %10 = vector.load %arg3[%c0_4, %c0_5] : memref<1x128xf32, #tpu.memory_space<vmem>>, vector<1x128xf32>
    %cst = arith.constant dense<0.000000e+00> : vector<8x128xf32>
    %11 = tpu.matmul %6, %9, %cst {dimension_numbers = #tpu.dot_dimension_numbers<[1], [0], [0], [1], [0, 0, 1, 1], [], []>} : vector<8x128xf32>, vector<128x128xf32>, vector<8x128xf32> -> vector<8x128xf32>
    %12 = vector.broadcast %10 : vector<1x128xf32> to vector<8x128xf32>
    %13 = arith.addf %11, %12 : vector<8x128xf32>
    %cst_6 = arith.constant 0.000000e+00 : f32
    %14 = vector.broadcast %cst_6 : f32 to vector<8x128xf32>
    %15 = arith.maximumf %13, %14 : vector<8x128xf32>
    %c1_i32_7 = arith.constant 1 : i32
    %16 = tpu.memref_slice %arg12[%c1_i32_7] : memref<3x!tpu.dma_semaphore, #tpu.memory_space<semaphore_mem>> -> memref<1x!tpu.dma_semaphore, #tpu.memory_space<semaphore_mem>>
    %17 = tpu.memref_squeeze %16 : memref<1x!tpu.dma_semaphore, #tpu.memory_space<semaphore_mem>> -> memref<!tpu.dma_semaphore, #tpu.memory_space<semaphore_mem>>
    tpu.wait_dma2 semaphore(%17 : memref<!tpu.dma_semaphore, #tpu.memory_space<semaphore_mem>>) src(%arg4 : memref<128x128xf32, #tpu.memory_space<any>>) dst(%arg10 : memref<128x128xf32, #tpu.memory_space<vmem>>)
    %c0_8 = arith.constant 0 : index
    %c0_9 = arith.constant 0 : index
    %18 = vector.load %arg10[%c0_8, %c0_9] : memref<128x128xf32, #tpu.memory_space<vmem>>, vector<128x128xf32>
    %c0_10 = arith.constant 0 : index
    %c0_11 = arith.constant 0 : index
    %19 = vector.load %arg5[%c0_10, %c0_11] : memref<1x128xf32, #tpu.memory_space<vmem>>, vector<1x128xf32>
    %cst_12 = arith.constant dense<0.000000e+00> : vector<8x128xf32>
    %20 = tpu.matmul %15, %18, %cst_12 {dimension_numbers = #tpu.dot_dimension_numbers<[1], [0], [0], [1], [0, 0, 1, 1], [], []>} : vector<8x128xf32>, vector<128x128xf32>, vector<8x128xf32> -> vector<8x128xf32>
    %21 = vector.broadcast %19 : vector<1x128xf32> to vector<8x128xf32>
    %22 = arith.addf %20, %21 : vector<8x128xf32>
    %cst_13 = arith.constant 0.000000e+00 : f32
    %23 = vector.broadcast %cst_13 : f32 to vector<8x128xf32>
    %24 = arith.maximumf %22, %23 : vector<8x128xf32>
    %c2_i32_14 = arith.constant 2 : i32
    %25 = tpu.memref_slice %arg12[%c2_i32_14] : memref<3x!tpu.dma_semaphore, #tpu.memory_space<semaphore_mem>> -> memref<1x!tpu.dma_semaphore, #tpu.memory_space<semaphore_mem>>
    %26 = tpu.memref_squeeze %25 : memref<1x!tpu.dma_semaphore, #tpu.memory_space<semaphore_mem>> -> memref<!tpu.dma_semaphore, #tpu.memory_space<semaphore_mem>>
    tpu.wait_dma2 semaphore(%26 : memref<!tpu.dma_semaphore, #tpu.memory_space<semaphore_mem>>) src(%arg6 : memref<128x128xf32, #tpu.memory_space<any>>) dst(%arg11 : memref<128x128xf32, #tpu.memory_space<vmem>>)
    %c0_15 = arith.constant 0 : index
    %c0_16 = arith.constant 0 : index
    %27 = vector.load %arg11[%c0_15, %c0_16] : memref<128x128xf32, #tpu.memory_space<vmem>>, vector<128x128xf32>
    %c0_17 = arith.constant 0 : index
    %c0_18 = arith.constant 0 : index
    %28 = vector.load %arg7[%c0_17, %c0_18] : memref<1x128xf32, #tpu.memory_space<vmem>>, vector<1x128xf32>
    %cst_19 = arith.constant dense<0.000000e+00> : vector<8x128xf32>
    %29 = tpu.matmul %24, %27, %cst_19 {dimension_numbers = #tpu.dot_dimension_numbers<[1], [0], [0], [1], [0, 0, 1, 1], [], []>} : vector<8x128xf32>, vector<128x128xf32>, vector<8x128xf32> -> vector<8x128xf32>
    %30 = vector.broadcast %28 : vector<1x128xf32> to vector<8x128xf32>
    %31 = arith.addf %29, %30 : vector<8x128xf32>
    %c0_20 = arith.constant 0 : index
    %c0_21 = arith.constant 0 : index
    %32 = vector.load %arg8[%c0_20, %c0_21] : memref<8x128xf32, #tpu.memory_space<vmem>>, vector<8x128xf32>
    tpu.vector_store %arg8[%c0_20, %c0_21], %31 {strides = array<i32>} : memref<8x128xf32, #tpu.memory_space<vmem>>, vector<8x128xf32>,
    return
  }
  func.func @transform_0(%arg0: i32) -> (i32, i32) {
    %c0_i32 = arith.constant 0 : i32
    %c0_i32_0 = arith.constant 0 : i32
    return %arg0, %c0_i32 : i32, i32
  }
  func.func @transform_2(%arg0: i32) -> (i32, i32) {
    %c0_i32 = arith.constant 0 : i32
    %c0_i32_0 = arith.constant 0 : i32
    %c0_i32_1 = arith.constant 0 : i32
    return %c0_i32, %c0_i32_0 : i32, i32
  }
  func.func @transform_4(%arg0: i32) -> (i32, i32) {
    %c0_i32 = arith.constant 0 : i32
    %c0_i32_0 = arith.constant 0 : i32
    %c0_i32_1 = arith.constant 0 : i32
    return %c0_i32, %c0_i32_0 : i32, i32
  }
  func.func @transform_6(%arg0: i32) -> (i32, i32) {
    %c0_i32 = arith.constant 0 : i32
    %c0_i32_0 = arith.constant 0 : i32
    %c0_i32_1 = arith.constant 0 : i32
    return %c0_i32, %c0_i32_0 : i32, i32
  }
  func.func @transform_7(%arg0: i32) -> (i32, i32) {
    %c0_i32 = arith.constant 0 : i32
    %c0_i32_0 = arith.constant 0 : i32
    return %arg0, %c0_i32 : i32, i32
  }
}

</mosaic_0001>

<bundles_post_ra>
// kernel: tpu_custom_call.1
= control target key start
LH: loop header
LB: loop body
LE: loop exit
PB: predicated region body
PF: predicated region fallthrough
CT: control target
= control target key end

     0   :  { %12 = vsyncpa [#allocation7], 0  ;;  %s902_s0 = inlined_call_operand.hbm [shape: f32[8,128], index: 0, kind: input, shape index: {}]   ;;  %s903_s1 = inlined_call_operand.hbm [shape: f32[128,128], index: 1, kind: input, shape index: {}]   ;;  %s904_s2 = inlined_call_operand.vmem [shape: f32[1,128], index: 2, kind: input, shape index: {}]   ;;  %s905_s3 = inlined_call_operand.hbm [shape: f32[128,128], index: 3, kind: input, shape index: {}]   ;;  %s906_s4 = inlined_call_operand.vmem [shape: f32[1,128], index: 4, kind: input, shape index: {}]   ;;  %s907_s5 = inlined_call_operand.hbm [shape: f32[128,128], index: 5, kind: input, shape index: {}]   ;;  %s908_s6 = inlined_call_operand.vmem [shape: f32[1,128], index: 6, kind: input, shape index: {}]   ;;  %s909_s7 = inlined_call_operand.hbm [shape: f32[8,128], index: 7, kind: output, shape index: {}]  }
   0x1   :  { %13 = vsyncpa [#allocation8], 0  ;;  %s755_s24 = smov [#allocation6]   ;;  %s635_s28 = scalar_lea.hbm %s902_s0, 128 }
   0x2   :  { %s20_s25 = sshll.u32 %s755_s24, 4  ;;  %p636_p0 = scmp.ne.s32.totalorder %s902_s0, %s635_s28  ;;  %s21_s25 = int_to_ptr.vmem [resolvable:$true] %s20_s25 }
   0x3   :  { %p639_p1 = scmp.lt.u32.totalorder %s635_s28, %s902_s0 }
   0x5   :  { %p641_p2 = pnand %p639_p1, %p636_p0 }
   0x7   :  { %644 = shalt.err (!%p641_p2)
}
   0x8   :  { %s645_s10 = scalar_lea.vmem %s21_s25, 128  ;;  %p650_p4 = scmp.lt.s32.totalorder %s21_s25, %s21_s25 }
   0x9   :  { %p646_p3 = scmp.ne.s32.totalorder %s21_s25, %s645_s10  ;;  %p651_p5 = scmp.lt.s32.totalorder %s645_s10, %s645_s10 }
   0xb   :  { %p652_p6 = por %p651_p5, %p650_p4 }
   0xd   :  { %p653_p7 = pnand %p652_p6, %p646_p3 }
   0xf   :  { %656 = shalt.err (!%p653_p7)
}
  0x10   :  { %23 = dma.hbm_to_vmem [thread:$0]  %s902_s0, 128, %s21_s25, [#allocation7]  }
  0x11   :  { %745 = dma.done.wait [#allocation7], 128  }
  0x12   :  { %746 = vsyncadd [#allocation7], 4294967168  ;;  %s756_s13 = smov [#allocation2]   ;;  %s757_s15 = smov [#allocation3]  }
  0x13   :  { %s40_s14 = sshll.u32 %s756_s13, 4  ;;  %s52_s16 = sshll.u32 %s757_s15, 4  ;;  %s41_s14 = int_to_ptr.vmem [resolvable:$true] %s40_s14  ;;  %s53_s16 = int_to_ptr.vmem [resolvable:$true] %s52_s16 }
  0x14   :  { %s657_s19 = scalar_lea.hbm %s903_s1, 2048 }
  0x15   :  { %p658_p8 = scmp.ne.s32.totalorder %s903_s1, %s657_s19  ;;  %p661_p9 = scmp.lt.u32.totalorder %s657_s19, %s903_s1 }
  0x17   :  { %p663_p10 = pnand %p661_p9, %p658_p8 }
  0x19   :  { %666 = shalt.err (!%p663_p10)  }
  0x1a   :  { %s667_s0 = scalar_lea.vmem %s41_s14, 2048  ;;  %p672_p12 = scmp.lt.s32.totalorder %s41_s14, %s41_s14 }
  0x1b   :  { %p668_p11 = scmp.ne.s32.totalorder %s41_s14, %s667_s0  ;;  %p673_p13 = scmp.lt.s32.totalorder %s667_s0, %s667_s0 }
  0x1d   :  { %p674_p0 = por %p673_p13, %p672_p12 }
  0x1f   :  { %p675_p1 = pnand %p674_p0, %p668_p11 }
  0x21   :  { %678 = shalt.err (!%p675_p1)  }
  0x22   :  { %43 = dma.hbm_to_vmem [thread:$0]  %s903_s1, 2048, %s41_s14, [#allocation5] }
  0x23   :  { %s679_s28 = scalar_lea.hbm %s905_s3, 2048 }
  0x24   :  { %p680_p2 = scmp.ne.s32.totalorder %s905_s3, %s679_s28  ;;  %p683_p3 = scmp.lt.u32.totalorder %s679_s28, %s905_s3 }
  0x26   :  { %p685_p4 = pnand %p683_p3, %p680_p2 }
  0x28   :  { %688 = shalt.err (!%p685_p4)  }
  0x29   :  { %s689_s10 = scalar_lea.vmem %s53_s16, 2048  ;;  %p694_p6 = scmp.lt.s32.totalorder %s53_s16, %s53_s16 }
  0x2a   :  { %p690_p5 = scmp.ne.s32.totalorder %s53_s16, %s689_s10  ;;  %p695_p7 = scmp.lt.s32.totalorder %s689_s10, %s689_s10 }
  0x2c   :  { %p696_p8 = por %p695_p7, %p694_p6 }
  0x2e   :  { %p697_p9 = pnand %p696_p8, %p690_p5 }
  0x30   :  { %700 = shalt.err (!%p697_p9)  }
  0x31   :  { %55 = dma.hbm_to_vmem [thread:$0]  %s905_s3, 2048, %s53_s16, [#allocation5 + $0x1]  ;;  %v68_v0 = vld [vmem:[#allocation6] sm:$0xff] }
  0x32   :  { %s758_s12 = smov [#allocation4]   ;;  %s701_s17 = scalar_lea.hbm %s907_s5, 2048 }
  0x33   :  { %s64_s13 = sshll.u32 %s758_s12, 4  ;;  %p702_p10 = scmp.ne.s32.totalorder %s907_s5, %s701_s17  ;;  %s65_s13 = int_to_ptr.vmem [resolvable:$true] %s64_s13 }
  0x34   :  { %p705_p11 = scmp.lt.u32.totalorder %s701_s17, %s907_s5 }
  0x36   :  { %p707_p12 = pnand %p705_p11, %p702_p10 }
  0x38   :  { %710 = shalt.err (!%p707_p12)  }
  0x39   :  { %s711_s22 = scalar_lea.vmem %s65_s13, 2048  ;;  %p716_p0 = scmp.lt.s32.totalorder %s65_s13, %s65_s13 }
  0x3a   :  { %p712_p13 = scmp.ne.s32.totalorder %s65_s13, %s711_s22  ;;  %p717_p1 = scmp.lt.s32.totalorder %s711_s22, %s711_s22 }
  0x3c   :  { %p718_p2 = por %p717_p1, %p716_p0 }
  0x3e   :  { %p719_p3 = pnand %p718_p2, %p712_p13 }
  0x40   :  { %722 = shalt.err (!%p719_p3)  }
  0x41   :  { %67 = dma.hbm_to_vmem [thread:$0]  %s907_s5, 2048, %s65_s13, [#allocation5 + $0x2] }
  0x42   :  { %747 = dma.done.wait [#allocation5], 2048 }
  0x43   :  { %748 = vsyncadd [#allocation5], 4294965248  ;;  %v759_v1 = vmov 0.0|0.0   ;;  %vm760_vm0 = vmmov 0   ;;  %v761_v2 = vmov 0.0   ;;  %v72_v3 = vld [vmem:[#allocation2] sm:$0xff] }
  0x44   :  { %555 = vmatprep.subr.bf16.mxu0 %v759_v1  ;;  %482 = vmatprep.mubr.msk.f32.mxu0 %vm760_vm0, %v761_v2  ;;  %v73_v4 = vld [vmem:[#allocation2 + $0x8] sm:$0xff]  ;;  %v74_v5 = vld [vmem:[#allocation2 + $0x10] sm:$0xff]  ;;  %v75_v7 = vld [vmem:[#allocation2 + $0x18] sm:$0xff] }
  0x45   :  { %v556_v6 = vpack.c.bf16 %v73_v4, %v72_v3  ;;  %v559_v8 = vpack.c.bf16 %v75_v7, %v74_v5  ;;  %v76_v9 = vld [vmem:[#allocation2 + $0x20] sm:$0xff]  ;;  %v77_v10 = vld [vmem:[#allocation2 + $0x28] sm:$0xff]  ;;  %v78_v12 = vld [vmem:[#allocation2 + $0x30] sm:$0xff] }
  0x46   :  { %v562_v11 = vpack.c.bf16 %v77_v10, %v76_v9  ;;  %v79_v13 = vld [vmem:[#allocation2 + $0x38] sm:$0xff]  ;;  %v80_v15 = vld [vmem:[#allocation2 + $0x40] sm:$0xff]  ;;  %v81_v16 = vld [vmem:[#allocation2 + $0x48] sm:$0xff] }
  0x47   :  { %557 = vmatpush3.bf16.msra.mxu0 %v556_v6  ;;  %v565_v14 = vpack.c.bf16 %v79_v13, %v78_v12  ;;  %v568_v17 = vpack.c.bf16 %v81_v16, %v80_v15  ;;  %v82_v18 = vld [vmem:[#allocation2 + $0x50] sm:$0xff]  ;;  %v83_v19 = vld [vmem:[#allocation2 + $0x58] sm:$0xff]  ;;  %v84_v21 = vld [vmem:[#allocation2 + $0x60] sm:$0xff] }
  0x48   :  { %558 = vmatprep.subr.bf16.mxu0 %v759_v1  ;;  %v571_v20 = vpack.c.bf16 %v83_v19, %v82_v18  ;;  %v85_v22 = vld [vmem:[#allocation2 + $0x68] sm:$0xff]  ;;  %v86_v24 = vld [vmem:[#allocation2 + $0x70] sm:$0xff]  ;;  %v87_v25 = vld [vmem:[#allocation2 + $0x78] sm:$0xff] }
  0x49   :  { %v574_v23 = vpack.c.bf16 %v85_v22, %v84_v21  ;;  %v577_v26 = vpack.c.bf16 %v87_v25, %v86_v24  ;;  %v393_v27 = vld [vmem:[%s904_s2] ss:$0 sm:$0xff] }
  0x4b   :  { %560 = vmatpush3.bf16.msra.mxu0 %v559_v8 }
  0x4c   :  { %561 = vmatprep.subr.bf16.mxu0 %v759_v1 }
  0x4f   :  { %563 = vmatpush3.bf16.msra.mxu0 %v562_v11 }
  0x50   :  { %564 = vmatprep.subr.bf16.mxu0 %v759_v1 }
  0x53   :  { %566 = vmatpush3.bf16.msra.mxu0 %v565_v14 }
  0x54   :  { %567 = vmatprep.subr.bf16.mxu0 %v759_v1 }
  0x57   :  { %569 = vmatpush3.bf16.msra.mxu0 %v568_v17 }
  0x58   :  { %570 = vmatprep.subr.bf16.mxu0 %v759_v1 }
  0x5b   :  { %572 = vmatpush3.bf16.msra.mxu0 %v571_v20 }
  0x5c   :  { %573 = vmatprep.subr.bf16.mxu0 %v759_v1 }
  0x5f   :  { %575 = vmatpush3.bf16.msra.mxu0 %v574_v23 }
  0x60   :  { %576 = vmatprep.subr.bf16.mxu0 %v759_v1 }
  0x63   :  { %578 = vmatpush3.bf16.msra.mxu0 %v577_v26 }
  0x66   :  { %483 = vmatmul.mubr.f32.vlgmr.msra.gmra.mrb[0].mxu0 %v68_v0 }
 0x139   :  { %v161_v28 = vpop.f32.mrb[0].mxu0 }
 0x13a   :  { %v162_v29 = vadd.f32 %v393_v27, %v161_v28  ;;  %v484_v30 = vpop.f32.mrb[1].mxu0 }
 0x13c   :  { %v165_v31 = vmax.f32 %v162_v29, 0.0 }
 0x13d   :  { %749 = dma.done.wait [#allocation5 + $0x1], 2048 }
 0x13e   :  { %750 = vsyncadd [#allocation5 + $0x1], 4294965248  ;;  %579 = vmatprep.subr.bf16.mxu1 %v759_v1  ;;  %517 = vmatprep.mubr.msk.f32.mxu1 %vm760_vm0, %v761_v2  ;;  %v168_v32 = vld [vmem:[#allocation3] sm:$0xff]  ;;  %v169_v33 = vld [vmem:[#allocation3 + $0x8] sm:$0xff] }
 0x13f   :  { %v170_v34 = vld [vmem:[#allocation3 + $0x10] sm:$0xff]  ;;  %v580_v35 = vpack.c.bf16 %v169_v33, %v168_v32  ;;  %v171_v36 = vld [vmem:[#allocation3 + $0x18] sm:$0xff]  ;;  %v172_v38 = vld [vmem:[#allocation3 + $0x20] sm:$0xff] }
 0x140   :  { %v583_v37 = vpack.c.bf16 %v171_v36, %v170_v34  ;;  %v173_v39 = vld [vmem:[#allocation3 + $0x28] sm:$0xff]  ;;  %v174_v41 = vld [vmem:[#allocation3 + $0x30] sm:$0xff]  ;;  %v175_v42 = vld [vmem:[#allocation3 + $0x38] sm:$0xff] }
 0x141   :  { %581 = vmatpush3.bf16.msra.mxu1 %v580_v35  ;;  %v586_v40 = vpack.c.bf16 %v173_v39, %v172_v38  ;;  %v589_v43 = vpack.c.bf16 %v175_v42, %v174_v41  ;;  %v176_v44 = vld [vmem:[#allocation3 + $0x40] sm:$0xff]  ;;  %v177_v45 = vld [vmem:[#allocation3 + $0x48] sm:$0xff]  ;;  %v178_v47 = vld [vmem:[#allocation3 + $0x50] sm:$0xff] }
 0x142   :  { %582 = vmatprep.subr.bf16.mxu1 %v759_v1  ;;  %v592_v46 = vpack.c.bf16 %v177_v45, %v176_v44  ;;  %v179_v48 = vld [vmem:[#allocation3 + $0x58] sm:$0xff]  ;;  %v180_v50 = vld [vmem:[#allocation3 + $0x60] sm:$0xff]  ;;  %v181_v51 = vld [vmem:[#allocation3 + $0x68] sm:$0xff] }
 0x143   :  { %v595_v49 = vpack.c.bf16 %v179_v48, %v178_v47  ;;  %v598_v52 = vpack.c.bf16 %v181_v51, %v180_v50  ;;  %v182_v53 = vld [vmem:[#allocation3 + $0x70] sm:$0xff]  ;;  %v183_v54 = vld [vmem:[#allocation3 + $0x78] sm:$0xff]  ;;  %v394_v56 = vld [vmem:[%s906_s4] ss:$0 sm:$0xff] }
 0x144   :  { %v601_v55 = vpack.c.bf16 %v183_v54, %v182_v53 }
 0x145   :  { %584 = vmatpush3.bf16.msra.mxu1 %v583_v37 }
 0x146   :  { %585 = vmatprep.subr.bf16.mxu1 %v759_v1 }
 0x149   :  { %587 = vmatpush3.bf16.msra.mxu1 %v586_v40 }
 0x14a   :  { %588 = vmatprep.subr.bf16.mxu1 %v759_v1 }
 0x14d   :  { %590 = vmatpush3.bf16.msra.mxu1 %v589_v43 }
 0x14e   :  { %591 = vmatprep.subr.bf16.mxu1 %v759_v1 }
 0x151   :  { %593 = vmatpush3.bf16.msra.mxu1 %v592_v46 }
 0x152   :  { %594 = vmatprep.subr.bf16.mxu1 %v759_v1 }
 0x155   :  { %596 = vmatpush3.bf16.msra.mxu1 %v595_v49 }
 0x156   :  { %597 = vmatprep.subr.bf16.mxu1 %v759_v1 }
 0x159   :  { %599 = vmatpush3.bf16.msra.mxu1 %v598_v52 }
 0x15a   :  { %600 = vmatprep.subr.bf16.mxu1 %v759_v1 }
 0x15d   :  { %602 = vmatpush3.bf16.msra.mxu1 %v601_v55 }
 0x160   :  { %518 = vmatmul.mubr.f32.vlgmr.msra.gmra.mrb[0].mxu1 %v165_v31 }
 0x233   :  { %v257_v57 = vpop.f32.mrb[0].mxu1 }
 0x234   :  { %v258_v58 = vadd.f32 %v394_v56, %v257_v57  ;;  %v519_v59 = vpop.f32.mrb[1].mxu1 }
 0x236   :  { %v261_v60 = vmax.f32 %v258_v58, 0.0 }
 0x237   :  { %751 = dma.done.wait [#allocation5 + $0x2], 2048 }
 0x238   :  { %752 = vsyncadd [#allocation5 + $0x2], 4294965248  ;;  %603 = vmatprep.subr.bf16.mxu0 %v759_v1  ;;  %552 = vmatprep.mubr.msk.f32.mxu0 %vm760_vm0, %v761_v2  ;;  %v264_v61 = vld [vmem:[#allocation4] sm:$0xff]  ;;  %v265_v62 = vld [vmem:[#allocation4 + $0x8] sm:$0xff]  ;;  %s762_s25 = smov [#allocation9]  }
 0x239   :  { %v266_v63 = vld [vmem:[#allocation4 + $0x10] sm:$0xff]  ;;  %v604_v0 = vpack.c.bf16 %v265_v62, %v264_v61  ;;  %v267_v3 = vld [vmem:[#allocation4 + $0x18] sm:$0xff]  ;;  %v268_v5 = vld [vmem:[#allocation4 + $0x20] sm:$0xff]  ;;  %s364_s26 = sshll.u32 %s762_s25, 4  ;;  %s365_s26 = int_to_ptr.vmem [resolvable:$true] %s364_s26 }
 0x23a   :  { %v607_v4 = vpack.c.bf16 %v267_v3, %v266_v63  ;;  %v269_v6 = vld [vmem:[#allocation4 + $0x28] sm:$0xff]  ;;  %v270_v8 = vld [vmem:[#allocation4 + $0x30] sm:$0xff]  ;;  %v271_v9 = vld [vmem:[#allocation4 + $0x38] sm:$0xff]  ;;  %s723_s27 = scalar_lea.vmem %s365_s26, 128  ;;  %p728_p5 = scmp.lt.s32.totalorder %s365_s26, %s365_s26 }
 0x23b   :  { %605 = vmatpush3.bf16.msra.mxu0 %v604_v0  ;;  %v610_v7 = vpack.c.bf16 %v269_v6, %v268_v5  ;;  %v613_v10 = vpack.c.bf16 %v271_v9, %v270_v8  ;;  %v272_v2 = vld [vmem:[#allocation4 + $0x40] sm:$0xff]  ;;  %v273_v11 = vld [vmem:[#allocation4 + $0x48] sm:$0xff]  ;;  %v274_v13 = vld [vmem:[#allocation4 + $0x50] sm:$0xff]  ;;  %p724_p4 = scmp.ne.s32.totalorder %s365_s26, %s723_s27  ;;  %p729_p6 = scmp.lt.s32.totalorder %s723_s27, %s723_s27 }
 0x23c   :  { %606 = vmatprep.subr.bf16.mxu0 %v759_v1  ;;  %v616_v12 = vpack.c.bf16 %v273_v11, %v272_v2  ;;  %v275_v14 = vld [vmem:[#allocation4 + $0x58] sm:$0xff]  ;;  %v276_v16 = vld [vmem:[#allocation4 + $0x60] sm:$0xff]  ;;  %v277_v17 = vld [vmem:[#allocation4 + $0x68] sm:$0xff] }
 0x23d   :  { %v619_v15 = vpack.c.bf16 %v275_v14, %v274_v13  ;;  %v622_v18 = vpack.c.bf16 %v277_v17, %v276_v16  ;;  %v278_v19 = vld [vmem:[#allocation4 + $0x70] sm:$0xff]  ;;  %v279_v20 = vld [vmem:[#allocation4 + $0x78] sm:$0xff]  ;;  %v395_v22 = vld [vmem:[%s908_s6] ss:$0 sm:$0xff]  ;;  %p730_p7 = por %p729_p6, %p728_p5 }
 0x23e   :  { %v625_v21 = vpack.c.bf16 %v279_v20, %v278_v19 }
 0x23f   :  { %608 = vmatpush3.bf16.msra.mxu0 %v607_v4  ;;  %p731_p8 = pnand %p730_p7, %p724_p4 }
 0x240   :  { %609 = vmatprep.subr.bf16.mxu0 %v759_v1 }
 0x243   :  { %611 = vmatpush3.bf16.msra.mxu0 %v610_v7 }
 0x244   :  { %612 = vmatprep.subr.bf16.mxu0 %v759_v1 }
 0x247   :  { %614 = vmatpush3.bf16.msra.mxu0 %v613_v10 }
 0x248   :  { %615 = vmatprep.subr.bf16.mxu0 %v759_v1 }
 0x24b   :  { %617 = vmatpush3.bf16.msra.mxu0 %v616_v12 }
 0x24c   :  { %618 = vmatprep.subr.bf16.mxu0 %v759_v1 }
 0x24f   :  { %620 = vmatpush3.bf16.msra.mxu0 %v619_v15 }
 0x250   :  { %621 = vmatprep.subr.bf16.mxu0 %v759_v1 }
 0x253   :  { %623 = vmatpush3.bf16.msra.mxu0 %v622_v18 }
 0x254   :  { %624 = vmatprep.subr.bf16.mxu0 %v759_v1 }
 0x257   :  { %626 = vmatpush3.bf16.msra.mxu0 %v625_v21 }
 0x25a   :  { %553 = vmatmul.mubr.f32.vlgmr.msra.gmra.mrb[2].mxu0 %v261_v60 }
 0x32d   :  { %v353_v23 = vpop.f32.mrb[2].mxu0 }
 0x32e   :  { %v354_v24 = vadd.f32 %v395_v22, %v353_v23  ;;  %v554_v25 = vpop.f32.mrb[3].mxu0 }
 0x330   :  { %357 = vst [vmem:[#allocation9] sm:$0xff] %v354_v24 }
 0x331   :  { %734 = shalt.err (!%p731_p8)
}
 0x332   :  { %s735_s30 = scalar_lea.hbm %s909_s7, 128 }
 0x333   :  { %p736_p9 = scmp.ne.s32.totalorder %s909_s7, %s735_s30  ;;  %p739_p10 = scmp.lt.u32.totalorder %s735_s30, %s909_s7 }
 0x335   :  { %p741_p11 = pnand %p739_p10, %p736_p9 }
 0x337   :  { %744 = shalt.err (!%p741_p11)
}
 0x338   :  { %367 = dma.vmem_to_hbm [thread:$0]  %s365_s26, 128, %s909_s7, [#allocation8]  }
 0x339   :  { %753 = dma.done.wait [#allocation8], 128  }
 0x33a   :  { %754 = vsyncadd [#allocation8], 4294967168 }
 0x33b   :  { %371 = vsyncpa [#allocation7], 1 }
 0x33c   :  { %372 = vsyncpa [#allocation8], 1 }
 0x33d   :  { %373 = vsyncmov [#allocation5] }
 0x340   :  { %s374_s12 = vpop.sfrf %373 }
 0x341   :  { %p396_p12 = scmp.ne.s32.totalorder %s374_s12, 0 }
 0x343   :  { %378 = shalt.err (%p396_p12)  }
 0x344   :  { %380 = vsyncmov [#allocation5 + $0x1] }
 0x347   :  { %s381_s13 = vpop.sfrf %380 }
 0x348   :  { %p397_p13 = scmp.ne.s32.totalorder %s381_s13, 0 }
 0x34a   :  { %385 = shalt.err (%p397_p13)  }
 0x34b   :  { %387 = vsyncmov [#allocation5 + $0x2] }
 0x34e   :  { %s388_s14 = vpop.sfrf %387 }
 0x34f   :  { %p398_p0 = scmp.ne.s32.totalorder %s388_s14, 0 }
 0x351   :  { %392 = shalt.err (%p398_p0)  }

// kernel: tpu_custom_call.1
= control target key start
LH: loop header
LB: loop body
LE: loop exit
PB: predicated region body
PF: predicated region fallthrough
CT: control target
= control target key end

     0   :  { %12 = vsyncpa [#allocation7], 0  ;;  %s902_s0 = inlined_call_operand.hbm [shape: f32[8,128], index: 0, kind: input, shape index: {}]   ;;  %s903_s1 = inlined_call_operand.hbm [shape: f32[128,128], index: 1, kind: input, shape index: {}]   ;;  %s904_s2 = inlined_call_operand.vmem [shape: f32[1,128], index: 2, kind: input, shape index: {}]   ;;  %s905_s3 = inlined_call_operand.hbm [shape: f32[128,128], index: 3, kind: input, shape index: {}]   ;;  %s906_s4 = inlined_call_operand.vmem [shape: f32[1,128], index: 4, kind: input, shape index: {}]   ;;  %s907_s5 = inlined_call_operand.hbm [shape: f32[128,128], index: 5, kind: input, shape index: {}]   ;;  %s908_s6 = inlined_call_operand.vmem [shape: f32[1,128], index: 6, kind: input, shape index: {}]   ;;  %s909_s7 = inlined_call_operand.hbm [shape: f32[8,128], index: 7, kind: output, shape index: {}]  }
   0x1   :  { %13 = vsyncpa [#allocation8], 0  ;;  %s755_s24 = smov [#allocation6]   ;;  %s635_s28 = scalar_lea.hbm %s902_s0, 128 }
   0x2   :  { %s20_s25 = sshll.u32 %s755_s24, 4  ;;  %p636_p0 = scmp.ne.s32.totalorder %s902_s0, %s635_s28  ;;  %s21_s25 = int_to_ptr.vmem [resolvable:$true] %s20_s25 }
   0x3   :  { %p639_p1 = scmp.lt.u32.totalorder %s635_s28, %s902_s0 }
   0x5   :  { %p641_p2 = pnand %p639_p1, %p636_p0 }
   0x7   :  { %644 = shalt.err (!%p641_p2)
}
   0x8   :  { %s645_s10 = scalar_lea.vmem %s21_s25, 128  ;;  %p650_p4 = scmp.lt.s32.totalorder %s21_s25, %s21_s25 }
   0x9   :  { %p646_p3 = scmp.ne.s32.totalorder %s21_s25, %s645_s10  ;;  %p651_p5 = scmp.lt.s32.totalorder %s645_s10, %s645_s10 }
   0xb   :  { %p652_p6 = por %p651_p5, %p650_p4 }
   0xd   :  { %p653_p7 = pnand %p652_p6, %p646_p3 }
   0xf   :  { %656 = shalt.err (!%p653_p7)
}
  0x10   :  { %23 = dma.hbm_to_vmem [thread:$0]  %s902_s0, 128, %s21_s25, [#allocation7]  }
  0x11   :  { %745 = dma.done.wait [#allocation7], 128  }
  0x12   :  { %746 = vsyncadd [#allocation7], 4294967168  ;;  %s756_s13 = smov [#allocation2]   ;;  %s757_s15 = smov [#allocation3]  }
  0x13   :  { %s40_s14 = sshll.u32 %s756_s13, 4  ;;  %s52_s16 = sshll.u32 %s757_s15, 4  ;;  %s41_s14 = int_to_ptr.vmem [resolvable:$true] %s40_s14  ;;  %s53_s16 = int_to_ptr.vmem [resolvable:$true] %s52_s16 }
  0x14   :  { %s657_s19 = scalar_lea.hbm %s903_s1, 2048 }
  0x15   :  { %p658_p8 = scmp.ne.s32.totalorder %s903_s1, %s657_s19  ;;  %p661_p9 = scmp.lt.u32.totalorder %s657_s19, %s903_s1 }
  0x17   :  { %p663_p10 = pnand %p661_p9, %p658_p8 }
  0x19   :  { %666 = shalt.err (!%p663_p10)  }
  0x1a   :  { %s667_s0 = scalar_lea.vmem %s41_s14, 2048  ;;  %p672_p12 = scmp.lt.s32.totalorder %s41_s14, %s41_s14 }
  0x1b   :  { %p668_p11 = scmp.ne.s32.totalorder %s41_s14, %s667_s0  ;;  %p673_p13 = scmp.lt.s32.totalorder %s667_s0, %s667_s0 }
  0x1d   :  { %p674_p0 = por %p673_p13, %p672_p12 }
  0x1f   :  { %p675_p1 = pnand %p674_p0, %p668_p11 }
  0x21   :  { %678 = shalt.err (!%p675_p1)  }
  0x22   :  { %43 = dma.hbm_to_vmem [thread:$0]  %s903_s1, 2048, %s41_s14, [#allocation5] }
  0x23   :  { %s679_s28 = scalar_lea.hbm %s905_s3, 2048 }
  0x24   :  { %p680_p2 = scmp.ne.s32.totalorder %s905_s3, %s679_s28  ;;  %p683_p3 = scmp.lt.u32.totalorder %s679_s28, %s905_s3 }
  0x26   :  { %p685_p4 = pnand %p683_p3, %p680_p2 }
  0x28   :  { %688 = shalt.err (!%p685_p4)  }
  0x29   :  { %s689_s10 = scalar_lea.vmem %s53_s16, 2048  ;;  %p694_p6 = scmp.lt.s32.totalorder %s53_s16, %s53_s16 }
  0x2a   :  { %p690_p5 = scmp.ne.s32.totalorder %s53_s16, %s689_s10  ;;  %p695_p7 = scmp.lt.s32.totalorder %s689_s10, %s689_s10 }
  0x2c   :  { %p696_p8 = por %p695_p7, %p694_p6 }
  0x2e   :  { %p697_p9 = pnand %p696_p8, %p690_p5 }
  0x30   :  { %700 = shalt.err (!%p697_p9)  }
  0x31   :  { %55 = dma.hbm_to_vmem [thread:$0]  %s905_s3, 2048, %s53_s16, [#allocation5 + $0x1]  ;;  %v68_v0 = vld [vmem:[#allocation6] sm:$0xff] }
  0x32   :  { %s758_s12 = smov [#allocation4]   ;;  %s701_s17 = scalar_lea.hbm %s907_s5, 2048 }
  0x33   :  { %s64_s13 = sshll.u32 %s758_s12, 4  ;;  %p702_p10 = scmp.ne.s32.totalorder %s907_s5, %s701_s17  ;;  %s65_s13 = int_to_ptr.vmem [resolvable:$true] %s64_s13 }
  0x34   :  { %p705_p11 = scmp.lt.u32.totalorder %s701_s17, %s907_s5 }
  0x36   :  { %p707_p12 = pnand %p705_p11, %p702_p10 }
  0x38   :  { %710 = shalt.err (!%p707_p12)  }
  0x39   :  { %s711_s22 = scalar_lea.vmem %s65_s13, 2048  ;;  %p716_p0 = scmp.lt.s32.totalorder %s65_s13, %s65_s13 }
  0x3a   :  { %p712_p13 = scmp.ne.s32.totalorder %s65_s13, %s711_s22  ;;  %p717_p1 = scmp.lt.s32.totalorder %s711_s22, %s711_s22 }
  0x3c   :  { %p718_p2 = por %p717_p1, %p716_p0 }
  0x3e   :  { %p719_p3 = pnand %p718_p2, %p712_p13 }
  0x40   :  { %722 = shalt.err (!%p719_p3)  }
  0x41   :  { %67 = dma.hbm_to_vmem [thread:$0]  %s907_s5, 2048, %s65_s13, [#allocation5 + $0x2] }
  0x42   :  { %747 = dma.done.wait [#allocation5], 2048 }
  0x43   :  { %748 = vsyncadd [#allocation5], 4294965248  ;;  %v759_v1 = vmov 0.0|0.0   ;;  %vm760_vm0 = vmmov 0   ;;  %v761_v2 = vmov 0.0   ;;  %v72_v3 = vld [vmem:[#allocation2] sm:$0xff] }
  0x44   :  { %555 = vmatprep.subr.bf16.mxu0 %v759_v1  ;;  %482 = vmatprep.mubr.msk.f32.mxu0 %vm760_vm0, %v761_v2  ;;  %v73_v4 = vld [vmem:[#allocation2 + $0x8] sm:$0xff]  ;;  %v74_v5 = vld [vmem:[#allocation2 + $0x10] sm:$0xff]  ;;  %v75_v7 = vld [vmem:[#allocation2 + $0x18] sm:$0xff] }
  0x45   :  { %v556_v6 = vpack.c.bf16 %v73_v4, %v72_v3  ;;  %v559_v8 = vpack.c.bf16 %v75_v7, %v74_v5  ;;  %v76_v9 = vld [vmem:[#allocation2 + $0x20] sm:$0xff]  ;;  %v77_v10 = vld [vmem:[#allocation2 + $0x28] sm:$0xff]  ;;  %v78_v12 = vld [vmem:[#allocation2 + $0x30] sm:$0xff] }
  0x46   :  { %v562_v11 = vpack.c.bf16 %v77_v10, %v76_v9  ;;  %v79_v13 = vld [vmem:[#allocation2 + $0x38] sm:$0xff]  ;;  %v80_v15 = vld [vmem:[#allocation2 + $0x40] sm:$0xff]  ;;  %v81_v16 = vld [vmem:[#allocation2 + $0x48] sm:$0xff] }
  0x47   :  { %557 = vmatpush3.bf16.msra.mxu0 %v556_v6  ;;  %v565_v14 = vpack.c.bf16 %v79_v13, %v78_v12  ;;  %v568_v17 = vpack.c.bf16 %v81_v16, %v80_v15  ;;  %v82_v18 = vld [vmem:[#allocation2 + $0x50] sm:$0xff]  ;;  %v83_v19 = vld [vmem:[#allocation2 + $0x58] sm:$0xff]  ;;  %v84_v21 = vld [vmem:[#allocation2 + $0x60] sm:$0xff] }
  0x48   :  { %558 = vmatprep.subr.bf16.mxu0 %v759_v1  ;;  %v571_v20 = vpack.c.bf16 %v83_v19, %v82_v18  ;;  %v85_v22 = vld [vmem:[#allocation2 + $0x68] sm:$0xff]  ;;  %v86_v24 = vld [vmem:[#allocation2 + $0x70] sm:$0xff]  ;;  %v87_v25 = vld [vmem:[#allocation2 + $0x78] sm:$0xff] }
  0x49   :  { %v574_v23 = vpack.c.bf16 %v85_v22, %v84_v21  ;;  %v577_v26 = vpack.c.bf16 %v87_v25, %v86_v24  ;;  %v393_v27 = vld [vmem:[%s904_s2] ss:$0 sm:$0xff] }
  0x4b   :  { %560 = vmatpush3.bf16.msra.mxu0 %v559_v8 }
  0x4c   :  { %561 = vmatprep.subr.bf16.mxu0 %v759_v1 }
  0x4f   :  { %563 = vmatpush3.bf16.msra.mxu0 %v562_v11 }
  0x50   :  { %564 = vmatprep.subr.bf16.mxu0 %v759_v1 }
  0x53   :  { %566 = vmatpush3.bf16.msra.mxu0 %v565_v14 }
  0x54   :  { %567 = vmatprep.subr.bf16.mxu0 %v759_v1 }
  0x57   :  { %569 = vmatpush3.bf16.msra.mxu0 %v568_v17 }
  0x58   :  { %570 = vmatprep.subr.bf16.mxu0 %v759_v1 }
  0x5b   :  { %572 = vmatpush3.bf16.msra.mxu0 %v571_v20 }
  0x5c   :  { %573 = vmatprep.subr.bf16.mxu0 %v759_v1 }
  0x5f   :  { %575 = vmatpush3.bf16.msra.mxu0 %v574_v23 }
  0x60   :  { %576 = vmatprep.subr.bf16.mxu0 %v759_v1 }
  0x63   :  { %578 = vmatpush3.bf16.msra.mxu0 %v577_v26 }
  0x66   :  { %483 = vmatmul.mubr.f32.vlgmr.msra.gmra.mrb[0].mxu0 %v68_v0 }
 0x139   :  { %v161_v28 = vpop.f32.mrb[0].mxu0 }
 0x13a   :  { %v162_v29 = vadd.f32 %v393_v27, %v161_v28  ;;  %v484_v30 = vpop.f32.mrb[1].mxu0 }
 0x13c   :  { %v165_v31 = vmax.f32 %v162_v29, 0.0 }
 0x13d   :  { %749 = dma.done.wait [#allocation5 + $0x1], 2048 }
 0x13e   :  { %750 = vsyncadd [#allocation5 + $0x1], 4294965248  ;;  %579 = vmatprep.subr.bf16.mxu1 %v759_v1  ;;  %517 = vmatprep.mubr.msk.f32.mxu1 %vm760_vm0, %v761_v2  ;;  %v168_v32 = vld [vmem:[#allocation3] sm:$0xff]  ;;  %v169_v33 = vld [vmem:[#allocation3 + $0x8] sm:$0xff] }
 0x13f   :  { %v170_v34 = vld [vmem:[#allocation3 + $0x10] sm:$0xff]  ;;  %v580_v35 = vpack.c.bf16 %v169_v33, %v168_v32  ;;  %v171_v36 = vld [vmem:[#allocation3 + $0x18] sm:$0xff]  ;;  %v172_v38 = vld [vmem:[#allocation3 + $0x20] sm:$0xff] }
 0x140   :  { %v583_v37 = vpack.c.bf16 %v171_v36, %v170_v34  ;;  %v173_v39 = vld [vmem:[#allocation3 + $0x28] sm:$0xff]  ;;  %v174_v41 = vld [vmem:[#allocation3 + $0x30] sm:$0xff]  ;;  %v175_v42 = vld [vmem:[#allocation3 + $0x38] sm:$0xff] }
 0x141   :  { %581 = vmatpush3.bf16.msra.mxu1 %v580_v35  ;;  %v586_v40 = vpack.c.bf16 %v173_v39, %v172_v38  ;;  %v589_v43 = vpack.c.bf16 %v175_v42, %v174_v41  ;;  %v176_v44 = vld [vmem:[#allocation3 + $0x40] sm:$0xff]  ;;  %v177_v45 = vld [vmem:[#allocation3 + $0x48] sm:$0xff]  ;;  %v178_v47 = vld [vmem:[#allocation3 + $0x50] sm:$0xff] }
 0x142   :  { %582 = vmatprep.subr.bf16.mxu1 %v759_v1  ;;  %v592_v46 = vpack.c.bf16 %v177_v45, %v176_v44  ;;  %v179_v48 = vld [vmem:[#allocation3 + $0x58] sm:$0xff]  ;;  %v180_v50 = vld [vmem:[#allocation3 + $0x60] sm:$0xff]  ;;  %v181_v51 = vld [vmem:[#allocation3 + $0x68] sm:$0xff] }
 0x143   :  { %v595_v49 = vpack.c.bf16 %v179_v48, %v178_v47  ;;  %v598_v52 = vpack.c.bf16 %v181_v51, %v180_v50  ;;  %v182_v53 = vld [vmem:[#allocation3 + $0x70] sm:$0xff]  ;;  %v183_v54 = vld [vmem:[#allocation3 + $0x78] sm:$0xff]  ;;  %v394_v56 = vld [vmem:[%s906_s4] ss:$0 sm:$0xff] }
 0x144   :  { %v601_v55 = vpack.c.bf16 %v183_v54, %v182_v53 }
 0x145   :  { %584 = vmatpush3.bf16.msra.mxu1 %v583_v37 }
 0x146   :  { %585 = vmatprep.subr.bf16.mxu1 %v759_v1 }
 0x149   :  { %587 = vmatpush3.bf16.msra.mxu1 %v586_v40 }
 0x14a   :  { %588 = vmatprep.subr.bf16.mxu1 %v759_v1 }
 0x14d   :  { %590 = vmatpush3.bf16.msra.mxu1 %v589_v43 }
 0x14e   :  { %591 = vmatprep.subr.bf16.mxu1 %v759_v1 }
 0x151   :  { %593 = vmatpush3.bf16.msra.mxu1 %v592_v46 }
 0x152   :  { %594 = vmatprep.subr.bf16.mxu1 %v759_v1 }
 0x155   :  { %596 = vmatpush3.bf16.msra.mxu1 %v595_v49 }
 0x156   :  { %597 = vmatprep.subr.bf16.mxu1 %v759_v1 }
 0x159   :  { %599 = vmatpush3.bf16.msra.mxu1 %v598_v52 }
 0x15a   :  { %600 = vmatprep.subr.bf16.mxu1 %v759_v1 }
 0x15d   :  { %602 = vmatpush3.bf16.msra.mxu1 %v601_v55 }
 0x160   :  { %518 = vmatmul.mubr.f32.vlgmr.msra.gmra.mrb[0].mxu1 %v165_v31 }
 0x233   :  { %v257_v57 = vpop.f32.mrb[0].mxu1 }
 0x234   :  { %v258_v58 = vadd.f32 %v394_v56, %v257_v57  ;;  %v519_v59 = vpop.f32.mrb[1].mxu1 }
 0x236   :  { %v261_v60 = vmax.f32 %v258_v58, 0.0 }
 0x237   :  { %751 = dma.done.wait [#allocation5 + $0x2], 2048 }
 0x238   :  { %752 = vsyncadd [#allocation5 + $0x2], 4294965248  ;;  %603 = vmatprep.subr.bf16.mxu0 %v759_v1  ;;  %552 = vmatprep.mubr.msk.f32.mxu0 %vm760_vm0, %v761_v2  ;;  %v264_v61 = vld [vmem:[#allocation4] sm:$0xff]  ;;  %v265_v62 = vld [vmem:[#allocation4 + $0x8] sm:$0xff]  ;;  %s762_s25 = smov [#allocation9]  }
 0x239   :  { %v266_v63 = vld [vmem:[#allocation4 + $0x10] sm:$0xff]  ;;  %v604_v0 = vpack.c.bf16 %v265_v62, %v264_v61  ;;  %v267_v3 = vld [vmem:[#allocation4 + $0x18] sm:$0xff]  ;;  %v268_v5 = vld [vmem:[#allocation4 + $0x20] sm:$0xff]  ;;  %s364_s26 = sshll.u32 %s762_s25, 4  ;;  %s365_s26 = int_to_ptr.vmem [resolvable:$true] %s364_s26 }
 0x23a   :  { %v607_v4 = vpack.c.bf16 %v267_v3, %v266_v63  ;;  %v269_v6 = vld [vmem:[#allocation4 + $0x28] sm:$0xff]  ;;  %v270_v8 = vld [vmem:[#allocation4 + $0x30] sm:$0xff]  ;;  %v271_v9 = vld [vmem:[#allocation4 + $0x38] sm:$0xff]  ;;  %s723_s27 = scalar_lea.vmem %s365_s26, 128  ;;  %p728_p5 = scmp.lt.s32.totalorder %s365_s26, %s365_s26 }
 0x23b   :  { %605 = vmatpush3.bf16.msra.mxu0 %v604_v0  ;;  %v610_v7 = vpack.c.bf16 %v269_v6, %v268_v5  ;;  %v613_v10 = vpack.c.bf16 %v271_v9, %v270_v8  ;;  %v272_v2 = vld [vmem:[#allocation4 + $0x40] sm:$0xff]  ;;  %v273_v11 = vld [vmem:[#allocation4 + $0x48] sm:$0xff]  ;;  %v274_v13 = vld [vmem:[#allocation4 + $0x50] sm:$0xff]  ;;  %p724_p4 = scmp.ne.s32.totalorder %s365_s26, %s723_s27  ;;  %p729_p6 = scmp.lt.s32.totalorder %s723_s27, %s723_s27 }
 0x23c   :  { %606 = vmatprep.subr.bf16.mxu0 %v759_v1  ;;  %v616_v12 = vpack.c.bf16 %v273_v11, %v272_v2  ;;  %v275_v14 = vld [vmem:[#allocation4 + $0x58] sm:$0xff]  ;;  %v276_v16 = vld [vmem:[#allocation4 + $0x60] sm:$0xff]  ;;  %v277_v17 = vld [vmem:[#allocation4 + $0x68] sm:$0xff] }
 0x23d   :  { %v619_v15 = vpack.c.bf16 %v275_v14, %v274_v13  ;;  %v622_v18 = vpack.c.bf16 %v277_v17, %v276_v16  ;;  %v278_v19 = vld [vmem:[#allocation4 + $0x70] sm:$0xff]  ;;  %v279_v20 = vld [vmem:[#allocation4 + $0x78] sm:$0xff]  ;;  %v395_v22 = vld [vmem:[%s908_s6] ss:$0 sm:$0xff]  ;;  %p730_p7 = por %p729_p6, %p728_p5 }
 0x23e   :  { %v625_v21 = vpack.c.bf16 %v279_v20, %v278_v19 }
 0x23f   :  { %608 = vmatpush3.bf16.msra.mxu0 %v607_v4  ;;  %p731_p8 = pnand %p730_p7, %p724_p4 }
 0x240   :  { %609 = vmatprep.subr.bf16.mxu0 %v759_v1 }
 0x243   :  { %611 = vmatpush3.bf16.msra.mxu0 %v610_v7 }
 0x244   :  { %612 = vmatprep.subr.bf16.mxu0 %v759_v1 }
 0x247   :  { %614 = vmatpush3.bf16.msra.mxu0 %v613_v10 }
 0x248   :  { %615 = vmatprep.subr.bf16.mxu0 %v759_v1 }
 0x24b   :  { %617 = vmatpush3.bf16.msra.mxu0 %v616_v12 }
 0x24c   :  { %618 = vmatprep.subr.bf16.mxu0 %v759_v1 }
 0x24f   :  { %620 = vmatpush3.bf16.msra.mxu0 %v619_v15 }
 0x250   :  { %621 = vmatprep.subr.bf16.mxu0 %v759_v1 }
 0x253   :  { %623 = vmatpush3.bf16.msra.mxu0 %v622_v18 }
 0x254   :  { %624 = vmatprep.subr.bf16.mxu0 %v759_v1 }
 0x257   :  { %626 = vmatpush3.bf16.msra.mxu0 %v625_v21 }
 0x25a   :  { %553 = vmatmul.mubr.f32.vlgmr.msra.gmra.mrb[2].mxu0 %v261_v60 }
 0x32d   :  { %v353_v23 = vpop.f32.mrb[2].mxu0 }
 0x32e   :  { %v354_v24 = vadd.f32 %v395_v22, %v353_v23  ;;  %v554_v25 = vpop.f32.mrb[3].mxu0 }
 0x330   :  { %357 = vst [vmem:[#allocation9] sm:$0xff] %v354_v24 }
 0x331   :  { %734 = shalt.err (!%p731_p8)
}
 0x332   :  { %s735_s30 = scalar_lea.hbm %s909_s7, 128 }
 0x333   :  { %p736_p9 = scmp.ne.s32.totalorder %s909_s7, %s735_s30  ;;  %p739_p10 = scmp.lt.u32.totalorder %s735_s30, %s909_s7 }
 0x335   :  { %p741_p11 = pnand %p739_p10, %p736_p9 }
 0x337   :  { %744 = shalt.err (!%p741_p11)
}
 0x338   :  { %367 = dma.vmem_to_hbm [thread:$0]  %s365_s26, 128, %s909_s7, [#allocation8]  }
 0x339   :  { %753 = dma.done.wait [#allocation8], 128  }
 0x33a   :  { %754 = vsyncadd [#allocation8], 4294967168 }
 0x33b   :  { %371 = vsyncpa [#allocation7], 1 }
 0x33c   :  { %372 = vsyncpa [#allocation8], 1 }
 0x33d   :  { %373 = vsyncmov [#allocation5] }
 0x340   :  { %s374_s12 = vpop.sfrf %373 }
 0x341   :  { %p396_p12 = scmp.ne.s32.totalorder %s374_s12, 0 }
 0x343   :  { %378 = shalt.err (%p396_p12)  }
 0x344   :  { %380 = vsyncmov [#allocation5 + $0x1] }
 0x347   :  { %s381_s13 = vpop.sfrf %380 }
 0x348   :  { %p397_p13 = scmp.ne.s32.totalorder %s381_s13, 0 }
 0x34a   :  { %385 = shalt.err (%p397_p13)  }
 0x34b   :  { %387 = vsyncmov [#allocation5 + $0x2] }
 0x34e   :  { %s388_s14 = vpop.sfrf %387 }
 0x34f   :  { %p398_p0 = scmp.ne.s32.totalorder %s388_s14, 0 }
 0x351   :  { %392 = shalt.err (%p398_p0)  }

</bundles_post_ra>
